<compile_context>
chip_gen: v6e
topology: v6e:2x2x1
jax: 0.10.0
libtpu: 0.0.40
codegen_flags: <defaults>
</compile_context>

<pallas_src>
import jax
import jax.numpy as jnp
from jax.experimental import pallas as pl
from jax.experimental.pallas import tpu as pltpu


def _rope_kernel(pos_ref, invf_ref, cos_ref, sin_ref):
    # pos_ref:  (1, TILE_S, 1)   f32  (positions on sublanes; size-1 lane dim)
    # invf_ref: (1, 1, half)     f32  (inv_freq on lanes)
    # cos_ref / sin_ref: (1, TILE_S, dim)  output dtype, dim = 2 * half
    half = invf_ref.shape[-1]

    pos = pos_ref[...]                    # (1, TILE_S, 1)
    invf = invf_ref[...]                  # (1, 1, half)
    freqs = pos * invf                    # (1, TILE_S, half) — free lane/sublane bcast

    c = jnp.cos(freqs).astype(cos_ref.dtype)
    s = jnp.sin(freqs).astype(sin_ref.dtype)

    # Both halves of the embedding are identical by construction: compute
    # cos/sin once, store twice (no concatenate, no double EUP work).
    cos_ref[:, :, :half] = c
    cos_ref[:, :, half:] = c
    sin_ref[:, :, :half] = s
    sin_ref[:, :, half:] = s


def make_inv_freq(dim: int, base: float = 10000.0) -> jnp.ndarray:
    # Matches: 1.0 / base ** (arange(0, dim, 2).float() / dim)
    exponents = jnp.arange(0, dim, 2, dtype=jnp.float32) / float(dim)
    return 1.0 / (base ** exponents)  # (dim/2,) float32


def _pick_tile_s(S: int, dim: int, out_itemsize: int) -> int:
    """Rows per grid step, rounded to the output dtype's sublane granule.

    Budget per grid step (double-buffered pipeline):
        2 outputs x 2 buffers x rows * dim * itemsize
      + 1 pos input x 2 buffers x rows * 512 B   ((rows,1) f32 pads lanes to 128)
    kept <= ~20 MiB: well under v5e/v6e's 128 MiB physical VMEM and leaves
    headroom (intermediates, internal scratch) on v7x's 64 MiB physical.
    """
    packing = max(1, 4 // out_itemsize)   # f32: 1, bf16: 2, int8/fp8: 4
    granule = 8 * packing                 # sublane packing granule in rows
    if S <= granule:
        return S                          # full-extent tile along S (always legal)
    budget = 20 * 1024 * 1024
    per_row = 4 * dim * out_itemsize + 2 * 512
    rows = min(8192, S, budget // per_row)
    rows -= rows % granule
    return max(granule, rows)


def gemma_rotary_embedding(x: jnp.ndarray,
                           position_ids: jnp.ndarray,
                           inv_freq: jnp.ndarray):
    """Returns (cos, sin), each (B, S, dim) in x.dtype, dim = 2 * len(inv_freq)."""
    B, S = position_ids.shape
    half = inv_freq.shape[0]
    dim = 2 * half
    out_dtype = x.dtype
    itemsize = jnp.dtype(out_dtype).itemsize

    tile_s = _pick_tile_s(S, dim, itemsize)
    grid = (B, pl.cdiv(S, tile_s))

    # Positions on sublanes (trailing size-1 lane dim), inv_freq on lanes.
    pos_f32 = position_ids.astype(jnp.float32).reshape(B, S, 1)
    invf_3d = inv_freq.astype(jnp.float32).reshape(1, 1, half)

    out_shape = (jax.ShapeDtypeStruct((B, S, dim), out_dtype),
                 jax.ShapeDtypeStruct((B, S, dim), out_dtype))

    cost = pl.CostEstimate(
        flops=int(B * S * half),
        transcendentals=int(2 * B * S * half),
        bytes_accessed=int(2 * B * S * dim * itemsize + B * S * 4 + half * 4),
    )

    cos, sin = pl.pallas_call(
        _rope_kernel,
        out_shape=out_shape,
        grid=grid,
        in_specs=[
            pl.BlockSpec((1, tile_s, 1), lambda b, s: (b, s, 0)),
            pl.BlockSpec((1, 1, half), lambda b, s: (0, 0, 0)),
        ],
        out_specs=(
            pl.BlockSpec((1, tile_s, dim), lambda b, s: (b, s, 0)),
            pl.BlockSpec((1, tile_s, dim), lambda b, s: (b, s, 0)),
        ),
        compiler_params=pltpu.CompilerParams(
            dimension_semantics=("parallel", "parallel"),
            vmem_limit_bytes=64 * 1024 * 1024),
        cost_estimate=cost,
    )(pos_f32, invf_3d)
    return cos, sin


def _reference(x, position_ids, inv_freq):
    pos = position_ids.astype(jnp.float32)
    freqs = pos[:, :, None] * inv_freq.astype(jnp.float32)[None, None, :]
    emb = jnp.concatenate([freqs, freqs], axis=-1)
    return jnp.cos(emb).astype(x.dtype), jnp.sin(emb).astype(x.dtype)


if __name__ == "__main__":
    base = 10000.0
    key = jax.random.PRNGKey(0)

    def check(B, S, dim, dtype, atol):
        # x only contributes dtype/device in the torch module
        x = jax.random.normal(key, (B, S, dim), dtype=jnp.float32).astype(dtype)
        position_ids = jnp.broadcast_to(jnp.arange(S, dtype=jnp.int32), (B, S))
        inv_freq = make_inv_freq(dim, base)

        cos, sin = gemma_rotary_embedding(x, position_ids, inv_freq)
        cos = jax.block_until_ready(cos)
        sin = jax.block_until_ready(sin)

        cos_ref, sin_ref = _reference(x, position_ids, inv_freq)
        assert cos.shape == (B, S, dim) and sin.shape == (B, S, dim)
        assert cos.dtype == dtype and sin.dtype == dtype
        assert jnp.allclose(cos.astype(jnp.float32), cos_ref.astype(jnp.float32),
                            atol=atol, rtol=0.0), (B, S, dim, dtype)
        assert jnp.allclose(sin.astype(jnp.float32), sin_ref.astype(jnp.float32),
                            atol=atol, rtol=0.0), (B, S, dim, dtype)

    # Small shape from the module spec (single full-extent tile path).
    check(B=2, S=8, dim=32, dtype=jnp.float32, atol=1e-4)
    # Non-divisible S exercises the cdiv grid + masked tail tile.
    check(B=2, S=20, dim=32, dtype=jnp.float32, atol=1e-4)
    # bf16 output path (real Gemma dtype): 16-row granule + tail tile.
    check(B=2, S=20, dim=32, dtype=jnp.bfloat16, atol=2e-2)

    print("KERNEL_OK")
</pallas_src>

<mosaic_0001>
module attributes {stable_mosaic.version = 11 : i64} {
  func.func @_rope_kernel(%arg0: i32, %arg1: i32, %arg2: memref<1x8x1xf32, #tpu.memory_space<vmem>>, %arg3: memref<1x1x16xf32, #tpu.memory_space<vmem>>, %arg4: memref<1x8x32xf32, #tpu.memory_space<vmem>>, %arg5: memref<1x8x32xf32, #tpu.memory_space<vmem>>) attributes {dimension_semantics = [#tpu.dimension_semantics<parallel>, #tpu.dimension_semantics<parallel>], iteration_bounds = array<i64: 2, 1>, scalar_prefetch = 0 : i64, scratch_operands = 0 : i64, tpu.core_type = #tpu.core_type<tc>, window_params = [{transform_indices = @transform_0, window_bounds = array<i64: 1, 8, 1>}, {pipeline_mode = #tpu.pipeline_mode<synchronous>, transform_indices = @transform_1, window_bounds = array<i64: 1, 1, 16>}, {transform_indices = @transform_2, window_bounds = array<i64: 1, 8, 32>}, {transform_indices = @transform_3, window_bounds = array<i64: 1, 8, 32>}]} {
    %c0 = arith.constant 0 : index
    %c0_0 = arith.constant 0 : index
    %c0_1 = arith.constant 0 : index
    %0 = vector.load %arg2[%c0, %c0_0, %c0_1] : memref<1x8x1xf32, #tpu.memory_space<vmem>>, vector<1x8x1xf32>
    %c0_2 = arith.constant 0 : index
    %c0_3 = arith.constant 0 : index
    %c0_4 = arith.constant 0 : index
    %1 = vector.load %arg3[%c0_2, %c0_3, %c0_4] : memref<1x1x16xf32, #tpu.memory_space<vmem>>, vector<1x1x16xf32>
    %2 = vector.broadcast %0 : vector<1x8x1xf32> to vector<1x8x16xf32>
    %3 = vector.broadcast %1 : vector<1x1x16xf32> to vector<1x8x16xf32>
    %4 = arith.mulf %2, %3 : vector<1x8x16xf32>
    %5 = math.cos %4 : vector<1x8x16xf32>
    %6 = math.sin %4 : vector<1x8x16xf32>
    %c0_5 = arith.constant 0 : index
    %c0_6 = arith.constant 0 : index
    %c0_7 = arith.constant 0 : index
    %7 = vector.load %arg4[%c0_5, %c0_6, %c0_7] : memref<1x8x32xf32, #tpu.memory_space<vmem>>, vector<1x8x16xf32>
    tpu.vector_store %arg4[%c0_5, %c0_6, %c0_7], %5 {strides = array<i32>} : memref<1x8x32xf32, #tpu.memory_space<vmem>>, vector<1x8x16xf32>,
    %c0_8 = arith.constant 0 : index
    %c0_9 = arith.constant 0 : index
    %c16 = arith.constant 16 : index
    %8 = vector.load %arg4[%c0_8, %c0_9, %c16] : memref<1x8x32xf32, #tpu.memory_space<vmem>>, vector<1x8x16xf32>
    tpu.vector_store %arg4[%c0_8, %c0_9, %c16], %5 {strides = array<i32>} : memref<1x8x32xf32, #tpu.memory_space<vmem>>, vector<1x8x16xf32>,
    %c0_10 = arith.constant 0 : index
    %c0_11 = arith.constant 0 : index
    %c0_12 = arith.constant 0 : index
    %9 = vector.load %arg5[%c0_10, %c0_11, %c0_12] : memref<1x8x32xf32, #tpu.memory_space<vmem>>, vector<1x8x16xf32>
    tpu.vector_store %arg5[%c0_10, %c0_11, %c0_12], %6 {strides = array<i32>} : memref<1x8x32xf32, #tpu.memory_space<vmem>>, vector<1x8x16xf32>,
    %c0_13 = arith.constant 0 : index
    %c0_14 = arith.constant 0 : index
    %c16_15 = arith.constant 16 : index
    %10 = vector.load %arg5[%c0_13, %c0_14, %c16_15] : memref<1x8x32xf32, #tpu.memory_space<vmem>>, vector<1x8x16xf32>
    tpu.vector_store %arg5[%c0_13, %c0_14, %c16_15], %6 {strides = array<i32>} : memref<1x8x32xf32, #tpu.memory_space<vmem>>, vector<1x8x16xf32>,
    return
  }
  func.func @transform_0(%arg0: i32, %arg1: i32) -> (i32, i32, i32) {
    %c0_i32 = arith.constant 0 : i32
    %c0_i32_0 = arith.constant 0 : i32
    return %arg0, %arg1, %c0_i32 : i32, i32, i32
  }
  func.func @transform_1(%arg0: i32, %arg1: i32) -> (i32, i32, i32) {
    %c0_i32 = arith.constant 0 : i32
    %c0_i32_0 = arith.constant 0 : i32
    %c0_i32_1 = arith.constant 0 : i32
    %c0_i32_2 = arith.constant 0 : i32
    return %c0_i32, %c0_i32_0, %c0_i32_1 : i32, i32, i32
  }
  func.func @transform_2(%arg0: i32, %arg1: i32) -> (i32, i32, i32) {
    %c0_i32 = arith.constant 0 : i32
    %c0_i32_0 = arith.constant 0 : i32
    return %arg0, %arg1, %c0_i32 : i32, i32, i32
  }
  func.func @transform_3(%arg0: i32, %arg1: i32) -> (i32, i32, i32) {
    %c0_i32 = arith.constant 0 : i32
    %c0_i32_0 = arith.constant 0 : i32
    return %arg0, %arg1, %c0_i32 : i32, i32, i32
  }
}

</mosaic_0001>

<bundles_post_ra>
// kernel: tpu_custom_call.1
= control target key start
LH: loop header
LB: loop body
LE: loop exit
PB: predicated region body
PF: predicated region fallthrough
CT: control target
= control target key end

     0   :  { %9 = vsyncpa [#allocation3], 0  ;;  %s984_s0 = inlined_call_operand.vmem [shape: f32[2,8,1], index: 0, kind: input, shape index: {}]   ;;  %s985_s1 = inlined_call_operand.vmem [shape: f32[1,1,16], index: 1, kind: input, shape index: {}]   ;;  %s986_s2 = inlined_call_operand.hbm [shape: f32[2,8,32], index: 2, kind: output, shape index: {0}]   ;;  %s987_s3 = inlined_call_operand.hbm [shape: f32[2,8,32], index: 3, kind: output, shape index: {1}]  }
   0x1   :  { %11 = vsyncpa [#allocation3 + $0x1], 0 }
   0x2   :  { %12 = vsyncpa [#allocation5], 0 }
   0x3   :  { %14 = vsyncpa [#allocation5 + $0x1], 0  ;;  %s815_s12 = smov 0   ;;  %s817_s13 = smov 0  }
   0x4   :  { %s819_s14 = smov 0   ;;  %s821_s15 = smov 0  }
   0x5   :  { %s823_s16 = smov 0   ;;  %s825_s17 = smov 0  }
   0x6 LB: > { %s577_s18 = sadd.s32 4294967295, %s783_s17   ;;  %s578_s19 = sadd.s32 4294967294, %s783_s17   ;;  %s783_s17 = sphi %s825_s17, %s20_s17   ;;  %s779_s16 = sphi %s823_s16, %s994_s16   ;;  %s775_s15 = sphi %s821_s15, %s993_s15   ;;  %s771_s14 = sphi %s819_s14, %s992_s14   ;;  %s767_s13 = sphi %s817_s13, %s991_s13   ;;  %s763_s12 = sphi %s815_s12, %s990_s12  }
   0x7   : > { %s32_s20 = sadd.s32 1, %s779_s16  ;;  %s90_s21 = sadd.s32 1, %s771_s14 }
   0x8   : > { %p34_p0 = scmp.ge.s32.totalorder %s32_s20, 2  ;;  %p100_p1 = scmp.ne.s32.totalorder %s771_s14, %s767_s13 }
   0x9   : > { %p101_p2 = scmp.eq.s32.totalorder %s577_s18, 1  ;;  %p106_p3 = scmp.ne.s32.totalorder %s767_s13, %s763_s12 }
   0xa   : > { %s996_s20 = smov (%p34_p0, %s32_s20), 0  ;;  %p107_p5 = scmp.eq.s32.totalorder %s578_s19, 1 }
   0xb   : > { %p855_p4 = por %p101_p2, %p100_p1  ;;  %s85_s23 = ssub.s32 %s779_s16, %s996_s20 }
   0xc   : > { %p581_p6 = scmp.ge.s32.totalorder %s783_s17, 1  ;;  %p88_p7 = scmp.eq.s32.totalorder %s85_s23, 0 }
   0xd   : > { %p862_p8 = por %p107_p5, %p106_p3  ;;  %p166_p9 = scmp.lt.s32.totalorder %s783_s17, 3 }
   0xe   : > { %s868_s25 = scalar_select %p88_p7, %s771_s14, %s90_s21  }
   0xf   : > { %p167_p10 = pnand %p581_p6, %p166_p9 }
  0x10   : > { %p197_p11 = scmp.lt.s32.totalorder (!%p167_p10), %s775_s15, 1  ;;  %s899_s6 = sand.u32 (!%p167_p10), 1, %s767_s13  }
  0x11   : > { %170 = sbr.rel (%p167_p10) target bundleno = 385 (0x181), region = 28  ;;  %s582_s7 = sshll.u32 (!%p167_p10), %s899_s6, 3 }
  0x12   : > { %s792_s8 = smov (!%p167_p10), 16   ;;  %s196_s9 = scalar_lea.vmem (!%p167_p10), [#allocation4], %s582_s7 }
  0x13   : > { %s189_s10 = scalar_lea.vmem (!%p167_p10), [#allocation2], %s582_s7  ;;  %s596_s11 = sshll.u32 (!%p167_p10), %s775_s15, 7 }
  0x14   : > { %s459_s18 = sshll.u32 (!%p167_p10), %s189_s10, 4  ;;  %s473_s19 = sshll.u32 (!%p167_p10), %s196_s9, 4  ;;  %s911_s18 = int_to_ptr.vmem [resolvable:$true] %s459_s18  ;;  %s918_s19 = int_to_ptr.vmem [resolvable:$true] %s473_s19 }
  0x15   : > { %s916_s29 = scalar_lea.hbm (!%p167_p10), %s987_s3, %s596_s11  ;;  %s793_s4 = smov (!%p167_p10), [#allocation2]  }
  0x16   : > { %v785_v0 = vmov 0   ;;  %s198_s26 = scalar_select %p197_p11, %s775_s15, 1  ;;  %v585_v2 = vld [vmem:[%s985_s1] ss:$0 sm:$0xff]  ;;  %v786_v16 = vmov 2102212464  }
  0x17   : > { %672 = vset.pattern.permute.xlu0 %v785_v0  ;;  %v787_v18 = vmov 920167782   ;;  %v788_v22 = vmov 1326507024   ;;  %v789_v24 = vmov 683565275  }
  0x18   : > { %s584_s27 = sshll.u32 %s198_s26, 3  ;;  %v790_v26 = vmov 2475754826   ;;  %v791_v29 = vmov 2131351028   ;;  %vm425_vm10 = vcmask 130048   ;;  %s909_s26 = scalar_lea.hbm %s986_s2, %s596_s11 }
  0x19   : > { %s203_s30 = scalar_lea.vmem %s984_s0, %s584_s27  ;;  %s440_s15 = scalar_lea.sflag [#allocation3], %s899_s6 }
  0x1a   : > { %v204_v1 = vld [vmem:[%s203_s30] sm:$0xff]  ;;  %s677_s30 = scalar_lea.vmem %s911_s18, 128  ;;  %s681_s5 = sshll.u32 %s793_s4, 4  ;;  %s682_s5 = int_to_ptr.vmem [resolvable:$false] %s681_s5 }
  0x1b   : > { %208 = vperm.xlu0 %672, %v204_v1   ;;  %p678_p12 = scmp.ne.s32.totalorder %s911_s18, %s677_s30  ;;  %s683_s7 = scalar_lea.vmem %s682_s5, 256 }
  0x1c   : > { %p684_p1 = scmp.lt.s32.totalorder %s911_s18, %s682_s5  ;;  %p685_p2 = scmp.lt.s32.totalorder %s683_s7, %s677_s30 }
  0x1d   : > { %p679_p13 = pnand %p678_p12, %p855_p4 }
  0x1e   : > { %p686_p3 = por %p685_p2, %p684_p1 }
  0x1f   : > { %p680_p0 = pneg %p679_p13 }
  0x21   : > { %p687_p5 = pnand %p686_p3, %p680_p0 }
  0x96   : > { %v209_v3 = vpop.permute.xlu0 %208 }
  0x97   : > { %v878_v4 = vmul.f32 %v585_v2, %v209_v3 }
  0x99   : > { %v221_v5 = vand.u32 2139095040, %v878_v4  ;;  %v218_v6 = vand.u32 2147483647, %v878_v4  ;;  %vm220_vm7 = vcmp.lt.s32.totalorder %v878_v4, 0 }
  0x9b   : > { %v222_v7 = vshrl.u32 %v221_v5, 23  ;;  %v225_v9 = vand.u32 8388607, %v218_v6  ;;  %vm219_vm8 = vcmp.le.f32.partialorder %v218_v6, 0.7853982 }
  0x9d   : > { %v586_v8 = vadd.s32 4294967169, %v222_v7  ;;  %v226_v12 = vor.u32 8388608, %v225_v9 }
  0x9f   : > { %v228_v10 = vadd.s32 1, %v586_v8  ;;  %v266_v20 = vshll.u32 %v226_v12, 8 }
  0xa1   : > { %vm229_vm0 = vcmp.gt.s32.totalorder %v228_v10, 0 }
  0xa2   : > { %v230_v11 = vsel %vm229_vm0, %v228_v10, 0  ;;  %vm310_vm0 = vweird.f32 %v878_v4 }
  0xa3   : > { %v232_v13 = vand.u32 31, %v230_v11  ;;  %v231_v14 = vshrl.u32 %v230_v11, 5 }
  0xa5   : > { %v233_v15 = vsub.s32 32, %v232_v13  ;;  %v244_v17 = vshll.u32 %v786_v16, %v232_v13  ;;  %v247_v19 = vshll.u32 %v787_v18, %v232_v13  ;;  %v235_v25 = vshll.u32 %v789_v24, %v232_v13 }
  0xa6   : > { %v238_v28 = vshll.u32 %v790_v26, %v232_v13  ;;  %v241_v31 = vshll.u32 %v791_v29, %v232_v13  ;;  %vm253_vm1 = vcmp.lt.s32.totalorder %v231_v14, 4  ;;  %vm250_vm2 = vcmp.lt.s32.totalorder %v231_v14, 1 }
  0xa7   : > { %v245_v21 = vshrl.u32 %v787_v18, %v233_v15  ;;  %v248_v23 = vshrl.u32 %v788_v22, %v233_v15  ;;  %v236_v27 = vshrl.u32 %v790_v26, %v233_v15  ;;  %v239_v30 = vshrl.u32 %v791_v29, %v233_v15 }
  0xa8   : > { %v242_v32 = vshrl.u32 %v786_v16, %v233_v15  ;;  %v234_v36 = vshrl.u32 %v789_v24, %v233_v15  ;;  %vm251_vm3 = vcmp.lt.s32.totalorder %v231_v14, 2  ;;  %vm252_vm4 = vcmp.lt.s32.totalorder %v231_v14, 3 }
  0xa9   : > { %v246_v33 = vor.u32 %v245_v21, %v244_v17  ;;  %v249_v34 = vor.u32 %v248_v23, %v247_v19  ;;  %v237_v35 = vor.u32 %v236_v27, %v235_v25  ;;  %v240_v37 = vor.u32 %v239_v30, %v238_v28 }
  0xaa   : > { %v243_v38 = vor.u32 %v242_v32, %v241_v31 }
  0xab   : > { %v259_v39 = vsel %vm253_vm1, %v246_v33, 920167782  ;;  %v263_v40 = vsel %vm253_vm1, %v249_v34, 1326507024  ;;  %v258_v42 = vsel %vm250_vm2, %v237_v35, %v240_v37  ;;  %v254_v45 = vsel %vm250_vm2, %v234_v36, %v237_v35 }
  0xac   : > { %v255_v41 = vsel %vm253_vm1, %v243_v38, 2102212464  ;;  %v260_v43 = vsel %vm252_vm4, %v243_v38, %v259_v39  ;;  %v262_v44 = vsel %vm250_vm2, %v240_v37, %v243_v38  ;;  %v264_v48 = vsel %vm252_vm4, %v246_v33, %v263_v40 }
  0xad   : > { %v256_v46 = vsel %vm252_vm4, %v240_v37, %v255_v41  ;;  %v261_v47 = vsel %vm251_vm3, %v258_v42, %v260_v43  ;;  %v265_v49 = vsel %vm251_vm3, %v262_v44, %v264_v48  ;;  %vm431_vm1 = vcmask 261248  }
  0xae   : > { %v884_v50 = vmul.u32.u64.low %v266_v20, %v261_v47  ;;  %v885_v51 = vmul.u32.u64.high %v266_v20, %v261_v47, %v884_v50  ;;  %v887_v52 = vmul.u32.u64.low %v266_v20, %v265_v49  ;;  %v888_v53 = vmul.u32.u64.high %v266_v20, %v265_v49, %v887_v52 }
  0xaf   : > { %v257_v54 = vsel %vm251_vm3, %v254_v45, %v256_v46 }
  0xb0   : > { %v276_v55 = vadd.s32 1, %v885_v51  ;;  %v273_v56 = vmul.u32 %v266_v20, %v257_v54  ;;  %vm275_vm5 = vc.u32 %v888_v53, %v884_v50  ;;  %v274_v5 = vadd.s32 %v884_v50, %v888_v53 }
  0xb2   : > { %v277_v57 = vsel %vm275_vm5, %v276_v55, %v885_v51 }
  0xb3   : > { %v278_v58 = vadd.s32 %v277_v57, %v273_v56 }
  0xb5   : > { %v279_v59 = vadd.s32 536870912, %v278_v58 }
  0xb7   : > { %v280_v60 = vshrl.u32 %v279_v59, 30 }
  0xb9   : > { %v281_v61 = vshll.u32 %v280_v60, 30  ;;  %v304_v19 = vsub.s32 4, %v280_v60 }
  0xbb   : > { %v282_v62 = vsub.s32 %v278_v58, %v281_v61  ;;  %v305_v22 = vsel %vm220_vm7, %v304_v19, %v280_v60 }
  0xbc   : > { %v307_v23 = vsel %vm219_vm8, 0, %v305_v22 }
  0xbd   : > { %v284_v63 = vsub.s32 0, %v282_v62  ;;  %v414_v24 = vadd.s32 3, %v307_v23  ;;  %v311_v26 = vand.u32 3, %v307_v23 }
  0xbf   : > { %v587_v0 = vmin.u32 %v284_v63, %v282_v62  ;;  %v415_v25 = vand.u32 3, %v414_v24  ;;  %vm316_vm11 = vcmp.eq.s32.totalorder %v311_v26, 2  ;;  %vm313_vm13 = vcmp.eq.s32.totalorder %v311_v26, 0 }
  0xc0   : > { %vm312_vm15 = vcmp.lt.s32.totalorder %v311_v26, 2 }
  0xc1   : > { %v286_v1 = vclz %v587_v0  ;;  %vm420_vm9 = vcmp.eq.s32.totalorder %v415_v25, 2  ;;  %vm417_vm12 = vcmp.eq.s32.totalorder %v415_v25, 0  ;;  %vm416_vm14 = vcmp.lt.s32.totalorder %v415_v25, 2 }
  0xc3   : > { %v588_v2 = vadd.s32 4294967294, %v286_v1 }
  0xc5   : > { %vm589_vm6 = vcmp.lt.s32.totalorder %v588_v2, 0 }
  0xc6   : > { %v289_v3 = vsel %vm589_vm6, 0, %v588_v2 }
  0xc7   : > { %v290_v7 = vsub.s32 32, %v289_v3  ;;  %v294_v8 = vsub.s32 4294967266, %v289_v3  ;;  %v291_v9 = vshll.u32 %v282_v62, %v289_v3 }
  0xc9   : > { %v292_v10 = vshrl.u32 %v274_v5, %v290_v7  ;;  %v295_v11 = vadd.s32 127, %v294_v8 }
  0xcb   : > { %v293_v12 = vor.u32 %v292_v10, %v291_v9  ;;  %v296_v13 = vshll.u32 %v295_v11, 23 }
  0xcd   : > { %v297_v14 = vor.u32 4788187, %v296_v13  ;;  %v300_v16 = vcvt.s32.f32 %v293_v12 }
  0xcf   : > { %v298_v15 = vand.u32 2147483647, %v297_v14 }
  0xd1   : > { %v301_v17 = vmul.f32 %v300_v16, %v298_v15 }
  0xd3   : > { %v302_v18 = vxor.u32 2147483648, %v301_v17 }
  0xd5   : > { %v303_v20 = vsel %vm220_vm7, %v302_v18, %v301_v17 }
  0xd6   : > { %v306_v21 = vsel %vm219_vm8, %v878_v4, %v303_v20 }
  0xd7   : > { %673 = vcosq.f32 %v306_v21 }
  0xd8   : > { %675 = vsinq.f32 %v306_v21 }
  0xe4   : > { %v674_v27 = vpop.eup %673 }
  0xe5   : > { %v676_v28 = vpop.eup %675  ;;  %v317_v29 = vxor.u32 2147483648, %v674_v27 }
  0xe6   : > { %v314_v30 = vxor.u32 2147483648, %v676_v28 }
  0xe7   : > { %v422_v6 = vsel %vm420_vm9, %v317_v29, %v676_v28  ;;  %v318_v31 = vsel %vm316_vm11, %v317_v29, %v676_v28 }
  0xe8   : > { %v419_v32 = vsel %vm417_vm12, %v674_v27, %v314_v30  ;;  %v315_v33 = vsel %vm313_vm13, %v674_v27, %v314_v30 }
  0xe9   : > { %v423_v34 = vsel %vm416_vm14, %v419_v32, %v422_v6  ;;  %v319_v35 = vsel %vm312_vm15, %v315_v33, %v318_v31 }
  0xea   : > { %v424_v36 = vsel %vm310_vm0, nan, %v423_v34  ;;  %v320_v37 = vsel %vm310_vm0, nan, %v319_v35 }
  0xeb   : > { %435 = vrot.lane.b32.xlu1 %v424_v36, %s792_s8  ;;  %433 = vst.msk [vmem:[%s196_s9] sm:$0xff] %vm425_vm10, %v424_v36  ;;  %428 = vrot.lane.b32.xlu0 %v320_v37, %s792_s8  ;;  %426 = vst.msk [vmem:[%s189_s10] sm:$0xff] %vm425_vm10, %v320_v37 }
 0x15d   : > { %v436_v4 = vpop.permute.xlu1 %435  ;;  %v429_v38 = vpop.permute.xlu0 %428 }
 0x15e   : > { %432 = vst.msk [vmem:[%s189_s10] sm:$0xff] %vm431_vm1, %v429_v38  ;;  %438 = vst.msk [vmem:[%s196_s9] sm:$0xff] %vm431_vm1, %v436_v4 }
 0x15f   : > { %690 = shalt.err (!%p687_p5)
}
 0x160   : > { %s691_s8 = scalar_lea.hbm %s909_s26, 128  ;;  %s695_s11 = scalar_lea.hbm %s986_s2, 256 }
 0x161   : > { %p692_p6 = scmp.ne.s32.totalorder %s909_s26, %s691_s8  ;;  %p696_p10 = scmp.lt.s32.totalorder %s909_s26, %s986_s2 }
 0x162   : > { %p697_p11 = scmp.lt.s32.totalorder %s695_s11, %s691_s8 }
 0x163   : > { %p693_p7 = pnand %p692_p6, %p855_p4 }
 0x164   : > { %p698_p12 = por %p697_p11, %p696_p10 }
 0x165   : > { %p694_p9 = pneg %p693_p7 }
 0x167   : > { %p699_p13 = pnand %p698_p12, %p694_p9 }
 0x169   : > { %702 = shalt.err (!%p699_p13)
}
 0x16a   : > { %604 = dma.vmem_to_hbm [thread:$0]  (%p855_p4), %s911_s18, 128, %s909_s26, %s440_s15  }
 0x16b   : > { %s445_s27 = scalar_lea.sflag [#allocation5], %s899_s6  ;;  %s703_s28 = scalar_lea.vmem %s918_s19, 128 }
 0x16c   : > { %p704_p0 = scmp.ne.s32.totalorder %s918_s19, %s703_s28  ;;  %s794_s30 = smov [#allocation4]  }
 0x16d   : > { %s707_s4 = sshll.u32 %s794_s30, 4  ;;  %s708_s4 = int_to_ptr.vmem [resolvable:$false] %s707_s4 }
 0x16e   : > { %p705_p1 = pnand %p704_p0, %p855_p4  ;;  %s709_s5 = scalar_lea.vmem %s708_s4, 256 }
 0x16f   : > { %p710_p3 = scmp.lt.s32.totalorder %s918_s19, %s708_s4  ;;  %p711_p5 = scmp.lt.s32.totalorder %s709_s5, %s703_s28 }
 0x170   : > { %p706_p2 = pneg %p705_p1 }
 0x171   : > { %p712_p6 = por %p711_p5, %p710_p3 }
 0x173   : > { %p713_p7 = pnand %p712_p6, %p706_p2 }
 0x175   : > { %716 = shalt.err (!%p713_p7)
}
 0x176   : > { %s717_s18 = scalar_lea.hbm %s916_s29, 128  ;;  %s721_s15 = scalar_lea.hbm %s987_s3, 256 }
 0x177   : > { %p718_p9 = scmp.ne.s32.totalorder %s916_s29, %s717_s18  ;;  %p722_p12 = scmp.lt.s32.totalorder %s916_s29, %s987_s3 }
 0x178   : > { %p723_p13 = scmp.lt.s32.totalorder %s721_s15, %s717_s18 }
 0x179   : > { %p719_p10 = pnand %p718_p9, %p855_p4 }
 0x17a   : > { %p724_p0 = por %p723_p13, %p722_p12 }
 0x17b   : > { %p720_p11 = pneg %p719_p10 }
 0x17d   : > { %p725_p1 = pnand %p724_p0, %p720_p11 }
 0x17f   : > { %728 = shalt.err (!%p725_p1)
}
 0x180   : > { %605 = dma.vmem_to_hbm [thread:$0]  (%p855_p4), %s918_s19, 128, %s916_s29, %s445_s27  }
 0x181 PF: > { %p615_p2 = scmp.ge.s32.totalorder %s783_s17, 2  ;;  %s485_s9 = sand.u32 1, %s763_s12  }
 0x182   : > { %s486_s10 = scalar_lea.sflag [#allocation3], %s485_s9 }
 0x183   : > { %p609_p3 = pnand %p615_p2, %p862_p8 }
 0x185   : > { %p610_p5 = pneg %p609_p3 }
 0x187   : > { %754 = dma.done.wait (%p610_p5), %s486_s10, 128  }
 0x188   : > { %756 = vsyncadd (%p610_p5), %s486_s10, 4294967168  ;;  %s495_s11 = scalar_lea.sflag [#allocation5], %s485_s9 }
 0x189   : > { %758 = dma.done.wait (%p610_p5), %s495_s11, 128  }
 0x18a   : > { %760 = vsyncadd (%p610_p5), %s495_s11, 4294967168  ;;  %s20_s17 = sadd.s32 1, %s783_s17   ;;  %s990_s12 = smov %s767_s13 }
 0x18b   : > { %p17_p6 = scmp.ge.s32.totalorder %s20_s17, 4   ;;  %s991_s13 = smov %s771_s14 }
 0x18c   : > { %s992_s14 = smov %s868_s25  ;;  %s993_s15 = smov %s779_s16 }
 0x18d   : > { %s994_s16 = smov %s996_s20  ;;  %19 = sbr.rel (!%p17_p6) target bundleno = 6 (0x6), region = 80 }
 0x192   :  { %500 = vsyncpa [#allocation3], 1 }
 0x193   :  { %502 = vsyncpa [#allocation3 + $0x1], 1 }
 0x194   :  { %503 = vsyncpa [#allocation5], 1 }
 0x195   :  { %505 = vsyncpa [#allocation5 + $0x1], 1 }

</bundles_post_ra>
